<compile_context>
chip_gen: v6e
topology: v6e:2x2x1
jax: 0.10.0
libtpu: 0.0.40
codegen_flags: <defaults>
</compile_context>

<pallas_src>
import functools
import math

import jax
import jax.numpy as jnp
import numpy as np
from jax.experimental import pallas as pl
from jax.experimental.pallas import tpu as pltpu


def _snr_kernel(preds_ref, labels_ref, basis_ref, out_ref, *,
                tb, kbins, k_start, low_idx, up_idx, win_size, n_bins):
    """One batch tile of the SNR loss.

    preds_ref / labels_ref : (TB, T)   compute-dtype time signals
    basis_ref              : (T, 2K)   [cos | sin] DFT basis, 1/N folded in
    out_ref                : (1, 1, TB) per-signal loss in dB (lane-dense)
    """
    basis = basis_ref[...]

    # Band-limited rfft of both tiles: two MXU matmuls against the resident
    # basis, accumulated in f32.  No concat copy, no in-kernel casts.
    spec_p = jnp.dot(preds_ref[...], basis, preferred_element_type=jnp.float32)
    spec_y = jnp.dot(labels_ref[...], basis, preferred_element_type=jnp.float32)

    # rfft Im carries a minus sign; irrelevant after squaring.  Zero-padding
    # to N contributes nothing, so only the T time samples are needed.
    p2 = spec_p[:, :kbins] ** 2 + spec_p[:, kbins:] ** 2        # |P|^2 (TB, K)
    y2 = spec_y[:, :kbins] ** 2 + spec_y[:, kbins:] ** 2        # |Y|^2 (TB, K)

    # Absolute rfft bin index of each kernel column.
    col = jax.lax.broadcasted_iota(jnp.int32, (tb, kbins), 1) + k_start
    band = (col >= low_idx) & (col < up_idx)                    # pulse band

    # hr = argmax of label power inside the pulse band (lowest index on ties).
    neg_inf = jnp.float32(-jnp.inf)
    y2_band = jnp.where(band, y2, neg_inf)
    mx = jnp.max(y2_band, axis=1, keepdims=True)
    is_max = (y2_band == mx) & band
    hr = jnp.min(jnp.where(is_max, col, jnp.int32(n_bins)),
                 axis=1, keepdims=True)                         # (TB, 1)

    # signal = [hr-win, hr+win); noise = [low, hr-win) U [hr+win, up), exactly
    # as in the PyTorch loop (empty slices reduce to zero sums).
    # TODO(synk): if low_idx < win_size, torch's negative slice start wraps to
    # the end of the spectrum; that degenerate parameter regime (not hit with
    # the default Fs=30 / N=1024) is not reproduced here.
    sig_mask = (col >= hr - win_size) & (col < hr + win_size) & (col < n_bins)
    noise_mask = band & jnp.logical_not(sig_mask)

    zero = jnp.float32(0.0)
    signal_amp = jnp.sum(jnp.where(sig_mask, p2, zero), axis=1, keepdims=True)
    noise_amp = jnp.sum(jnp.where(noise_mask, p2, zero), axis=1, keepdims=True)

    inv_log10 = jnp.float32(1.0 / math.log(10.0))
    loss = -10.0 * jnp.log(signal_amp / (noise_amp + 1e-7)) * inv_log10  # (TB,1)
    out_ref[...] = jnp.transpose(loss).reshape(1, 1, tb)        # lane-dense row


@functools.lru_cache(maxsize=8)
def _dft_basis(t_len, n_fft, k_start, kbins, dtype_name):
    """Band-limited rfft basis [cos | sin], 'forward' 1/N scaling folded in."""
    t = np.arange(t_len, dtype=np.float64)[:, None]
    k = (k_start + np.arange(kbins, dtype=np.float64))[None, :]
    ang = 2.0 * np.pi * t * k / float(n_fft)
    basis = np.concatenate([np.cos(ang), np.sin(ang)], axis=1) / float(n_fft)
    return jnp.asarray(basis, dtype=jnp.dtype(dtype_name))      # (T, 2K)


def snr_loss_db_signals(preds, labels, Fs=30, N=1024, pulse_band=None,
                        compute_dtype=jnp.bfloat16):
    """JAX/Pallas equivalent of SNRLoss_dB_Signals.forward; returns scalar f32."""
    if pulse_band is None:
        pulse_band = [45 / 60.0, 180 / 60.0]
    compute_dtype = jnp.dtype(compute_dtype)

    T = preds.shape[-1]
    preds2 = preds.reshape(-1, T)
    labels2 = labels.reshape(-1, T)
    if T > N:                       # torch.fft.rfft(x, n=N) crops longer inputs
        preds2 = preds2[:, :N]
        labels2 = labels2[:, :N]
        T = N
    # Host-side cast to the compute dtype: halves input DMA bytes and removes
    # the in-kernel cast pass.  (Pass compute_dtype=jnp.float32 for parity.)
    preds2 = preds2.astype(compute_dtype)
    labels2 = labels2.astype(compute_dtype)
    B = preds2.shape[0]

    win_size = int(N / 256)
    n_bins = N // 2 + 1
    freq = np.linspace(0.0, Fs / 2.0, n_bins).astype(np.float32)
    low_idx = int(np.argmin(np.abs(freq - pulse_band[0])))
    up_idx = int(np.argmin(np.abs(freq - pulse_band[1])))

    # Only bins [low-win, up+win) are ever read; build just that band of the
    # DFT, rounded up to a lane-dense multiple of 128 columns.
    k_start = max(0, low_idx - win_size)
    kbins = 128 * int(pl.cdiv(max(up_idx + win_size - k_start, 1), 128))
    basis = _dft_basis(T, N, k_start, kbins, compute_dtype.name)

    # Batch tile: pad only to the sublane packing (16 rows bf16 / 8 rows f32),
    # grow the tile up to 1024 rows to amortize the ~0.35us per-grid-step
    # overhead, and split into >=2 tiles when the batch allows so both v7x
    # TensorCores get work via the "parallel" grid axis.
    row = 16 if compute_dtype.itemsize == 2 else 8
    tb_cap = 1024
    b_al = row * int(pl.cdiv(B, row))
    TB = min(tb_cap, b_al)
    if TB > row and int(pl.cdiv(B, TB)) < 2:
        TB = row * int(pl.cdiv(TB, 2 * row))      # ~half, sublane-aligned
    B_pad = TB * int(pl.cdiv(B, TB))
    if B_pad != B:
        pad = ((0, B_pad - B), (0, 0))
        preds2 = jnp.pad(preds2, pad)
        labels2 = jnp.pad(labels2, pad)
    nb = B_pad // TB

    kernel = functools.partial(
        _snr_kernel, tb=TB, kbins=kbins, k_start=k_start,
        low_idx=low_idx, up_idx=up_idx, win_size=win_size, n_bins=n_bins)

    per_signal = pl.pallas_call(
        kernel,
        out_shape=jax.ShapeDtypeStruct((nb, 1, TB), jnp.float32),
        grid=(nb,),
        in_specs=[
            pl.BlockSpec((TB, T), lambda i: (i, 0)),            # preds tile
            pl.BlockSpec((TB, T), lambda i: (i, 0)),            # labels tile
            pl.BlockSpec((T, 2 * kbins), lambda i: (0, 0),      # basis: constant
                         pipeline_mode=pl.Buffered(1)),         # single-buffered
        ],
        out_specs=pl.BlockSpec((1, 1, TB), lambda i: (i, 0, 0)),  # lane-dense
        compiler_params=pltpu.CompilerParams(
            dimension_semantics=("parallel",),                  # megacore on v7x
            vmem_limit_bytes=32 * 1024 * 1024),                 # v5e headroom
    )(preds2, labels2, basis)

    # Padded (all-zero) rows produce +/-inf losses; slice them out before the mean.
    return jnp.mean(per_signal.reshape(-1)[:B])


if __name__ == "__main__":
    key = jax.random.PRNGKey(0)
    k1, k2 = jax.random.split(key)
    # (batch=2, channels=4, T=128) -> flattened to B=8 signals of length 128
    T = 128
    preds = jax.random.normal(k1, (2, 4, T), dtype=jnp.float32)
    # labels: noisy sinusoids inside the pulse band so the argmax is meaningful
    tt = jnp.arange(T, dtype=jnp.float32) / 30.0
    labels = jnp.sin(2.0 * jnp.pi * 1.5 * tt)[None, None, :] * jnp.ones((2, 4, 1))
    labels = labels + 0.1 * jax.random.normal(k2, (2, 4, T), dtype=jnp.float32)

    loss = snr_loss_db_signals(preds, labels, Fs=30)
    jax.block_until_ready(loss)
    print("KERNEL_OK")
</pallas_src>

<mosaic_0001>
module attributes {stable_mosaic.version = 11 : i64} {
  func.func @_snr_kernel(%arg0: i32, %arg1: memref<16x128xbf16, #tpu.memory_space<vmem>>, %arg2: memref<16x128xbf16, #tpu.memory_space<vmem>>, %arg3: memref<128x256xbf16, #tpu.memory_space<vmem>>, %arg4: memref<1x1x16xf32, #tpu.memory_space<vmem>>) attributes {dimension_semantics = [#tpu.dimension_semantics<parallel>], iteration_bounds = array<i64: 1>, scalar_prefetch = 0 : i64, scratch_operands = 0 : i64, tpu.core_type = #tpu.core_type<tc>, window_params = [{transform_indices = @transform_0, window_bounds = array<i64: 16, 128>}, {transform_indices = @transform_1, window_bounds = array<i64: 16, 128>}, {pipeline_mode = #tpu.pipeline_mode<synchronous>, transform_indices = @transform_2, window_bounds = array<i64: 128, 256>}, {transform_indices = @transform_3, window_bounds = array<i64: 1, 1, 16>}]} {
    %c0 = arith.constant 0 : index
    %c0_0 = arith.constant 0 : index
    %0 = vector.load %arg3[%c0, %c0_0] : memref<128x256xbf16, #tpu.memory_space<vmem>>, vector<128x256xbf16>
    %c0_1 = arith.constant 0 : index
    %c0_2 = arith.constant 0 : index
    %1 = vector.load %arg1[%c0_1, %c0_2] : memref<16x128xbf16, #tpu.memory_space<vmem>>, vector<16x128xbf16>
    %cst = arith.constant dense<0.000000e+00> : vector<16x256xf32>
    %2 = tpu.matmul %1, %0, %cst {dimension_numbers = #tpu.dot_dimension_numbers<[1], [0], [0], [1], [0, 0, 1, 1], [], []>} : vector<16x128xbf16>, vector<128x256xbf16>, vector<16x256xf32> -> vector<16x256xf32>
    %c0_3 = arith.constant 0 : index
    %c0_4 = arith.constant 0 : index
    %3 = vector.load %arg2[%c0_3, %c0_4] : memref<16x128xbf16, #tpu.memory_space<vmem>>, vector<16x128xbf16>
    %cst_5 = arith.constant dense<0.000000e+00> : vector<16x256xf32>
    %4 = tpu.matmul %3, %0, %cst_5 {dimension_numbers = #tpu.dot_dimension_numbers<[1], [0], [0], [1], [0, 0, 1, 1], [], []>} : vector<16x128xbf16>, vector<128x256xbf16>, vector<16x256xf32> -> vector<16x256xf32>
    %5 = vector.extract_strided_slice %2 {offsets = [0, 0], sizes = [16, 128], strides = [1, 1]} : vector<16x256xf32> to vector<16x128xf32>
    %6 = arith.mulf %5, %5 : vector<16x128xf32>
    %7 = vector.extract_strided_slice %2 {offsets = [0, 128], sizes = [16, 128], strides = [1, 1]} : vector<16x256xf32> to vector<16x128xf32>
    %8 = arith.mulf %7, %7 : vector<16x128xf32>
    %9 = arith.addf %6, %8 : vector<16x128xf32>
    %10 = vector.extract_strided_slice %4 {offsets = [0, 0], sizes = [16, 128], strides = [1, 1]} : vector<16x256xf32> to vector<16x128xf32>
    %11 = arith.mulf %10, %10 : vector<16x128xf32>
    %12 = vector.extract_strided_slice %4 {offsets = [0, 128], sizes = [16, 128], strides = [1, 1]} : vector<16x256xf32> to vector<16x128xf32>
    %13 = arith.mulf %12, %12 : vector<16x128xf32>
    %14 = arith.addf %11, %13 : vector<16x128xf32>
    %15 = tpu.iota {dimensions = array<i32: 1>} : vector<16x128xi32>
    %c22_i32 = arith.constant 22 : i32
    %16 = vector.broadcast %c22_i32 : i32 to vector<16x128xi32>
    %17 = arith.addi %15, %16 : vector<16x128xi32>
    %c26_i32 = arith.constant 26 : i32
    %18 = vector.broadcast %c26_i32 : i32 to vector<16x128xi32>
    %19 = arith.cmpi sge, %17, %18 : vector<16x128xi32>
    %c102_i32 = arith.constant 102 : i32
    %20 = vector.broadcast %c102_i32 : i32 to vector<16x128xi32>
    %21 = arith.cmpi slt, %17, %20 : vector<16x128xi32>
    %22 = arith.andi %19, %21 : vector<16x128xi1>
    %cst_6 = arith.constant 0xFF800000 : f32
    %23 = vector.broadcast %cst_6 : f32 to vector<16x128xf32>
    %24 = arith.select %22, %14, %23 : vector<16x128xi1>, vector<16x128xf32>
    %cst_7 = arith.constant dense<0xFF800000> : vector<16xf32>
    %25 = vector.multi_reduction <maximumf>, %24, %cst_7 [1] : vector<16x128xf32> to vector<16xf32>
    %26 = vector.shape_cast %25 : vector<16xf32> to vector<16x1xf32>
    %27 = vector.broadcast %26 : vector<16x1xf32> to vector<16x128xf32>
    %28 = arith.cmpf oeq, %24, %27 : vector<16x128xf32>
    %29 = arith.andi %28, %22 : vector<16x128xi1>
    %c513_i32 = arith.constant 513 : i32
    %30 = vector.broadcast %c513_i32 : i32 to vector<16x128xi32>
    %31 = arith.select %29, %17, %30 : vector<16x128xi1>, vector<16x128xi32>
    %cst_8 = arith.constant dense<2147483647> : vector<16xi32>
    %32 = vector.multi_reduction <minsi>, %31, %cst_8 [1] : vector<16x128xi32> to vector<16xi32>
    %33 = vector.shape_cast %32 : vector<16xi32> to vector<16x1xi32>
    %c4_i32 = arith.constant 4 : i32
    %34 = vector.broadcast %c4_i32 : i32 to vector<16x1xi32>
    %35 = arith.subi %33, %34 : vector<16x1xi32>
    %36 = vector.broadcast %35 : vector<16x1xi32> to vector<16x128xi32>
    %37 = arith.cmpi sge, %17, %36 : vector<16x128xi32>
    %c4_i32_9 = arith.constant 4 : i32
    %38 = vector.broadcast %c4_i32_9 : i32 to vector<16x1xi32>
    %39 = arith.addi %33, %38 : vector<16x1xi32>
    %40 = vector.broadcast %39 : vector<16x1xi32> to vector<16x128xi32>
    %41 = arith.cmpi slt, %17, %40 : vector<16x128xi32>
    %42 = arith.andi %37, %41 : vector<16x128xi1>
    %c513_i32_10 = arith.constant 513 : i32
    %43 = vector.broadcast %c513_i32_10 : i32 to vector<16x128xi32>
    %44 = arith.cmpi slt, %17, %43 : vector<16x128xi32>
    %45 = arith.andi %42, %44 : vector<16x128xi1>
    %cst_11 = arith.constant dense<true> : vector<16x128xi1>
    %46 = arith.xori %45, %cst_11 : vector<16x128xi1>
    %47 = arith.andi %22, %46 : vector<16x128xi1>
    %cst_12 = arith.constant 0.000000e+00 : f32
    %48 = vector.broadcast %cst_12 : f32 to vector<16x128xf32>
    %49 = arith.select %45, %9, %48 : vector<16x128xi1>, vector<16x128xf32>
    %cst_13 = arith.constant dense<0.000000e+00> : vector<16xf32>
    %50 = vector.multi_reduction <add>, %49, %cst_13 [1] : vector<16x128xf32> to vector<16xf32>
    %51 = vector.shape_cast %50 : vector<16xf32> to vector<16x1xf32>
    %cst_14 = arith.constant 0.000000e+00 : f32
    %52 = vector.broadcast %cst_14 : f32 to vector<16x128xf32>
    %53 = arith.select %47, %9, %52 : vector<16x128xi1>, vector<16x128xf32>
    %cst_15 = arith.constant dense<0.000000e+00> : vector<16xf32>
    %54 = vector.multi_reduction <add>, %53, %cst_15 [1] : vector<16x128xf32> to vector<16xf32>
    %55 = vector.shape_cast %54 : vector<16xf32> to vector<16x1xf32>
    %cst_16 = arith.constant 1.000000e-07 : f32
    %56 = vector.broadcast %cst_16 : f32 to vector<16x1xf32>
    %57 = arith.addf %55, %56 : vector<16x1xf32>
    %58 = arith.divf %51, %57 : vector<16x1xf32>
    %59 = math.log %58 : vector<16x1xf32>
    %cst_17 = arith.constant -1.000000e+01 : f32
    %60 = vector.broadcast %cst_17 : f32 to vector<16x1xf32>
    %61 = arith.mulf %60, %59 : vector<16x1xf32>
    %cst_18 = arith.constant 0.434294492 : f32
    %62 = vector.broadcast %cst_18 : f32 to vector<16x1xf32>
    %63 = arith.mulf %61, %62 : vector<16x1xf32>
    %64 = tpu.transpose %63, [1, 0] : vector<16x1xf32> -> vector<1x16xf32>
    %65 = vector.shape_cast %64 : vector<1x16xf32> to vector<1x1x16xf32>
    %c0_19 = arith.constant 0 : index
    %c0_20 = arith.constant 0 : index
    %c0_21 = arith.constant 0 : index
    %66 = vector.load %arg4[%c0_19, %c0_20, %c0_21] : memref<1x1x16xf32, #tpu.memory_space<vmem>>, vector<1x1x16xf32>
    tpu.vector_store %arg4[%c0_19, %c0_20, %c0_21], %65 {strides = array<i32>} : memref<1x1x16xf32, #tpu.memory_space<vmem>>, vector<1x1x16xf32>,
    return
  }
  func.func @transform_0(%arg0: i32) -> (i32, i32) {
    %c0_i32 = arith.constant 0 : i32
    %c0_i32_0 = arith.constant 0 : i32
    return %arg0, %c0_i32 : i32, i32
  }
  func.func @transform_1(%arg0: i32) -> (i32, i32) {
    %c0_i32 = arith.constant 0 : i32
    %c0_i32_0 = arith.constant 0 : i32
    return %arg0, %c0_i32 : i32, i32
  }
  func.func @transform_2(%arg0: i32) -> (i32, i32) {
    %c0_i32 = arith.constant 0 : i32
    %c0_i32_0 = arith.constant 0 : i32
    %c0_i32_1 = arith.constant 0 : i32
    return %c0_i32, %c0_i32_0 : i32, i32
  }
  func.func @transform_3(%arg0: i32) -> (i32, i32, i32) {
    %c0_i32 = arith.constant 0 : i32
    %c0_i32_0 = arith.constant 0 : i32
    %c0_i32_1 = arith.constant 0 : i32
    return %arg0, %c0_i32, %c0_i32_0 : i32, i32, i32
  }
}

</mosaic_0001>

<bundles_post_ra>
// kernel: tpu_custom_call.1
= control target key start
LH: loop header
LB: loop body
LE: loop exit
PB: predicated region body
PF: predicated region fallthrough
CT: control target
= control target key end

     0   :  { %8 = vsyncpa [#allocation3], 0  ;;  %s633_s0 = inlined_call_operand.hbm [shape: bf16[16,128], index: 0, kind: input, shape index: {}]   ;;  %s634_s1 = inlined_call_operand.hbm [shape: bf16[16,128], index: 1, kind: input, shape index: {}]   ;;  %s635_s2 = inlined_call_operand.hbm [shape: bf16[128,256], index: 2, kind: input, shape index: {}]   ;;  %s636_s3 = inlined_call_operand.hbm [shape: f32[1,1,16], index: 3, kind: output, shape index: {}]  }
   0x1   :  { %9 = vsyncpa [#allocation6], 0 }
   0x2   :  { %10 = vsyncpa [#allocation4], 0  ;;  %s557_s12 = smov [#allocation5]   ;;  %s558_s14 = smov [#allocation2]  }
   0x3   :  { %s28_s13 = sshll.u32 %s557_s12, 4  ;;  %s16_s15 = sshll.u32 %s558_s14, 4  ;;  %s29_s13 = int_to_ptr.vmem [resolvable:$true] %s28_s13  ;;  %s17_s15 = int_to_ptr.vmem [resolvable:$true] %s16_s15 }
   0x4   :  { %s479_s16 = scalar_lea.vmem %s29_s13, 128  ;;  %p484_p1 = scmp.lt.s32.totalorder %s29_s13, %s29_s13 }
   0x5   :  { %p480_p0 = scmp.ne.s32.totalorder %s29_s13, %s479_s16  ;;  %p485_p2 = scmp.lt.s32.totalorder %s479_s16, %s479_s16 }
   0x7   :  { %p486_p3 = por %p485_p2, %p484_p1 }
   0x9   :  { %p487_p4 = pnand %p486_p3, %p480_p0 }
   0xb   :  { %490 = shalt.err (!%p487_p4)
}
   0xc   :  { %s559_s17 = smov 64   ;;  %s560_s18 = smov 4  }
   0xd   :  { %34 = dma.hbm_to_vmem [thread:$0]  %s634_s1, 128, %s29_s13, [#allocation6], %s559_s17, %s559_s17, %s560_s18  }
   0xe   :  { %s499_s21 = scalar_lea.vmem %s17_s15, 128  ;;  %p504_p6 = scmp.lt.s32.totalorder %s17_s15, %s17_s15 }
   0xf   :  { %p500_p5 = scmp.ne.s32.totalorder %s17_s15, %s499_s21  ;;  %p505_p7 = scmp.lt.s32.totalorder %s499_s21, %s499_s21 }
  0x11   :  { %p506_p8 = por %p505_p7, %p504_p6 }
  0x13   :  { %p507_p9 = pnand %p506_p8, %p500_p5 }
  0x15   :  { %510 = shalt.err (!%p507_p9)
}
  0x16   :  { %22 = dma.hbm_to_vmem [thread:$0]  %s633_s0, 128, %s17_s15, [#allocation3], %s559_s17, %s559_s17, %s560_s18  }
  0x17   :  { %s561_s24 = smov [#allocation7]  }
  0x18   :  { %s40_s25 = sshll.u32 %s561_s24, 4  ;;  %s41_s25 = int_to_ptr.vmem [resolvable:$true] %s40_s25 }
  0x19   :  { %s519_s26 = scalar_lea.vmem %s41_s25, 2048  ;;  %p524_p11 = scmp.lt.s32.totalorder %s41_s25, %s41_s25 }
  0x1a   :  { %p520_p10 = scmp.ne.s32.totalorder %s41_s25, %s519_s26  ;;  %p525_p12 = scmp.lt.s32.totalorder %s519_s26, %s519_s26 }
  0x1c   :  { %p526_p13 = por %p525_p12, %p524_p11 }
  0x1e   :  { %p527_p0 = pnand %p526_p13, %p520_p10 }
  0x20   :  { %530 = shalt.err (!%p527_p0)
}
  0x21   :  { %s562_s1 = smov 128   ;;  %s563_s27 = smov 8  }
  0x22   :  { %46 = dma.hbm_to_vmem [thread:$0]  %s635_s2, 2048, %s41_s25, [#allocation6], %s562_s1, %s562_s1, %s563_s27  }
  0x23   :  { %551 = dma.done.wait [#allocation3], 128  }
  0x24   :  { %552 = vsyncadd [#allocation3], 4294967168 }
  0x25   :  { %553 = dma.done.wait [#allocation6], 2176  }
  0x26   :  { %554 = vsyncadd [#allocation6], 4294965120  ;;  %v564_v0 = vmov 0   ;;  %v437_v1 = vld [vmem:[#allocation7 + $0x74] ss:$8 sps:$4 sm:$0xff]   ;;  %v267_v18 = vlaneseq  ;;  %vm565_vm12 = vmmov 1  }
  0x27   :  { %244 = vmatprep.mubr.bf16.mxu1 %v564_v0  ;;  %193 = vmatprep.mubr.bf16.mxu0 %v564_v0  ;;  %v439_v2 = vld [vmem:[#allocation7 + $0x70] ss:$8 sps:$4 sm:$0xff]   ;;  %v440_v3 = vld [vmem:[#allocation7 + $0x64] ss:$8 sps:$4 sm:$0xff]   ;;  %v442_v4 = vld [vmem:[#allocation7 + $0x60] ss:$8 sps:$4 sm:$0xff]  }
  0x28   :  { %212 = vmatprep.subr.bf16.mxu1 %v437_v1  ;;  %161 = vmatprep.subr.bf16.mxu0 %v437_v1  ;;  %v443_v5 = vld [vmem:[#allocation7 + $0x54] ss:$8 sps:$4 sm:$0xff]   ;;  %v445_v6 = vld [vmem:[#allocation7 + $0x50] ss:$8 sps:$4 sm:$0xff]   ;;  %v446_v7 = vld [vmem:[#allocation7 + $0x44] ss:$8 sps:$4 sm:$0xff]  }
  0x29   :  { %213 = vmatpush1.bf16.msra.mxu1 %v439_v2  ;;  %162 = vmatpush1.bf16.msra.mxu0 %v439_v2  ;;  %v448_v8 = vld [vmem:[#allocation7 + $0x40] ss:$8 sps:$4 sm:$0xff]   ;;  %v449_v9 = vld [vmem:[#allocation7 + $0x34] ss:$8 sps:$4 sm:$0xff]   ;;  %v451_v10 = vld [vmem:[#allocation7 + $0x30] ss:$8 sps:$4 sm:$0xff]  }
  0x2a   :  { %214 = vmatprep.subr.bf16.mxu1 %v440_v3  ;;  %163 = vmatprep.subr.bf16.mxu0 %v440_v3  ;;  %v452_v11 = vld [vmem:[#allocation7 + $0x24] ss:$8 sps:$4 sm:$0xff]   ;;  %v454_v12 = vld [vmem:[#allocation7 + $0x20] ss:$8 sps:$4 sm:$0xff]   ;;  %v455_v13 = vld [vmem:[#allocation7 + $0x14] ss:$8 sps:$4 sm:$0xff]  }
  0x2b   :  { %v457_v14 = vld [vmem:[#allocation7 + $0x10] ss:$8 sps:$4 sm:$0xff]   ;;  %v458_v15 = vld [vmem:[#allocation7 + $0x4] ss:$8 sps:$4 sm:$0xff]   ;;  %v460_v16 = vld [vmem:[#allocation7] ss:$8 sps:$4 sm:$0xff]  }
  0x2c   :  { %v461_v17 = vld [vmem:[#allocation5] sm:$0xff]   ;;  %v268_v19 = vand.u32 127, %v267_v18  ;;  %v462_v34 = vld [vmem:[#allocation2] sm:$0xff]   ;;  %s566_s0 = smov [#allocation8]  }
  0x2d   :  { %215 = vmatpush1.bf16.msra.mxu1 %v442_v4  ;;  %164 = vmatpush1.bf16.msra.mxu0 %v442_v4  ;;  %s396_s2 = sshll.u32 %s566_s0, 4  ;;  %s397_s2 = int_to_ptr.vmem [resolvable:$true] %s396_s2 }
  0x2e   :  { %216 = vmatprep.subr.bf16.mxu1 %v443_v5  ;;  %165 = vmatprep.subr.bf16.mxu0 %v443_v5  ;;  %v596_v20 = vadd.s32 22, %v268_v19  ;;  %s531_s30 = scalar_lea.vmem %s397_s2, 16  ;;  %s535_s4 = scalar_lea.vmem %s397_s2, 32 }
  0x2f   :  { %p532_p1 = scmp.ne.s32.totalorder %s397_s2, %s531_s30  ;;  %p536_p2 = scmp.lt.s32.totalorder %s397_s2, %s397_s2 }
  0x30   :  { %vm270_vm0 = vcmp.ge.s32.totalorder %v596_v20, 26  ;;  %vm271_vm1 = vcmp.lt.s32.totalorder %v596_v20, 102  ;;  %p537_p3 = scmp.lt.s32.totalorder %s535_s4, %s531_s30 }
  0x31   :  { %217 = vmatpush1.bf16.msra.mxu1 %v445_v6  ;;  %166 = vmatpush1.bf16.msra.mxu0 %v445_v6  ;;  %vm600_vm2 = vmand %vm270_vm0, %vm271_vm1 }
  0x32   :  { %218 = vmatprep.subr.bf16.mxu1 %v446_v7  ;;  %167 = vmatprep.subr.bf16.mxu0 %v446_v7  ;;  %p538_p4 = por %p537_p3, %p536_p2 }
  0x34   :  { %p539_p5 = pnand %p538_p4, %p532_p1 }
  0x35   :  { %219 = vmatpush1.bf16.msra.mxu1 %v448_v8  ;;  %168 = vmatpush1.bf16.msra.mxu0 %v448_v8 }
  0x36   :  { %220 = vmatprep.subr.bf16.mxu1 %v449_v9  ;;  %169 = vmatprep.subr.bf16.mxu0 %v449_v9 }
  0x39   :  { %221 = vmatpush1.bf16.msra.mxu1 %v451_v10  ;;  %170 = vmatpush1.bf16.msra.mxu0 %v451_v10 }
  0x3a   :  { %222 = vmatprep.subr.bf16.mxu1 %v452_v11  ;;  %171 = vmatprep.subr.bf16.mxu0 %v452_v11 }
  0x3d   :  { %223 = vmatpush1.bf16.msra.mxu1 %v454_v12  ;;  %172 = vmatpush1.bf16.msra.mxu0 %v454_v12 }
  0x3e   :  { %224 = vmatprep.subr.bf16.mxu1 %v455_v13  ;;  %173 = vmatprep.subr.bf16.mxu0 %v455_v13 }
  0x41   :  { %225 = vmatpush1.bf16.msra.mxu1 %v457_v14  ;;  %174 = vmatpush1.bf16.msra.mxu0 %v457_v14 }
  0x42   :  { %226 = vmatprep.subr.bf16.mxu1 %v458_v15  ;;  %175 = vmatprep.subr.bf16.mxu0 %v458_v15 }
  0x45   :  { %227 = vmatpush1.bf16.msra.mxu1 %v460_v16  ;;  %176 = vmatpush1.bf16.msra.mxu0 %v460_v16 }
  0x48   :  { %245 = vmatmul.mubr.bf16.vlgmr.msra.gmra.mxu1 %v461_v17  ;;  %194 = vmatmul.mubr.bf16.vlgmr.msra.gmra.mxu0 %v462_v34 }
 0x108   :  { %v246_v21 = vpop.f32.mrf.mxu1  ;;  %v195_v51 = vpop.f32.mrf.mxu0 }
 0x109   :  { %v261_v23 = vmul.f32 %v246_v21, %v246_v21  ;;  %v255_v61 = vmul.f32 %v195_v51, %v195_v51 }
 0x10a   :  { %v248_v22 = vpop.f32.mrf.mxu1  ;;  %v197_v53 = vpop.f32.mrf.mxu0 }
 0x10b   :  { %v263_v24 = vmul.f32 %v248_v22, %v248_v22  ;;  %v257_v1 = vmul.f32 %v197_v53, %v197_v53 }
 0x10c   :  { %v250_v25 = vpop.f32.mrf.mxu1  ;;  %v199_v58 = vpop.f32.mrf.mxu0 }
 0x10d   :  { %v265_v27 = vadd.f32 %v263_v24, %v261_v23  ;;  %v262_v29 = vmul.f32 %v250_v25, %v250_v25  ;;  %v256_v5 = vmul.f32 %v199_v58, %v199_v58  ;;  %v259_v10 = vadd.f32 %v257_v1, %v255_v61 }
 0x10e   :  { %v252_v28 = vpop.f32.mrf.mxu1  ;;  %v201_v3 = vpop.f32.mrf.mxu0 }
 0x10f   :  { %v264_v30 = vmul.f32 %v252_v28, %v252_v28  ;;  %v273_v31 = vsel %vm600_vm2, %v265_v27, -inf  ;;  %v258_v9 = vmul.f32 %v201_v3, %v201_v3 }
 0x110   :  { %275 = vmax.xlane.f32.xlu0 %v273_v31 }
 0x111   :  { %v266_v32 = vadd.f32 %v264_v30, %v262_v29  ;;  %v260_v12 = vadd.f32 %v258_v9, %v256_v5 }
 0x113   :  { %v274_v33 = vsel %vm600_vm2, %v266_v32, -inf }
 0x114   :  { %277 = vmax.xlane.f32.xlu0 %v274_v33 }
 0x199   :  { %v276_v35 = vpop.xlane.xlu0 %275 }
 0x19a   :  { %vm279_vm3 = vcmp.eq.f32.partialorder %v273_v31, %v276_v35 }
 0x19b   :  { %vm281_vm4 = vmand %vm279_vm3, %vm600_vm2 }
 0x19c   :  { %v283_v36 = vsel %vm281_vm4, %v596_v20, 513 }
 0x19d   :  { %v278_v37 = vpop.xlane.xlu0 %277  ;;  %v286_v38 = vshra.s32 %v283_v36, 16  ;;  %v285_v43 = vand.u32 65535, %v283_v36 }
 0x19e   :  { %vm280_vm5 = vcmp.eq.f32.partialorder %v274_v33, %v278_v37 }
 0x19f   :  { %vm282_vm6 = vmand %vm280_vm5, %vm600_vm2  ;;  %v288_v39 = vcvt.s32.f32 %v286_v38  ;;  %v287_v45 = vcvt.s32.f32 %v285_v43 }
 0x1a0   :  { %v284_v40 = vsel %vm282_vm6, %v596_v20, 513 }
 0x1a1   :  { %289 = vmin.xlane.f32.xlu1 %v288_v39  ;;  %v300_v41 = vshra.s32 %v284_v40, 16  ;;  %v299_v46 = vand.u32 65535, %v284_v40 }
 0x1a3   :  { %v302_v42 = vcvt.s32.f32 %v300_v41  ;;  %v301_v49 = vcvt.s32.f32 %v299_v46 }
 0x1a5   :  { %303 = vmin.xlane.f32.xlu1 %v302_v42 }
 0x22a   :  { %v290_v44 = vpop.xlane.xlu1 %289 }
 0x22b   :  { %vm291_vm7 = vcmp.eq.f32.partialorder %v288_v39, %v290_v44  ;;  %v296_v52 = vcvt.f32.s32 %v290_v44 }
 0x22c   :  { %v292_v47 = vsel %vm291_vm7, %v287_v45, inf }
 0x22d   :  { %293 = vmin.xlane.f32.xlu0 %v292_v47  ;;  %v297_v56 = vshll.u32 %v296_v52, 16 }
 0x22e   :  { %v304_v48 = vpop.xlane.xlu1 %303 }
 0x22f   :  { %vm305_vm8 = vcmp.eq.f32.partialorder %v302_v42, %v304_v48  ;;  %v310_v54 = vcvt.f32.s32 %v304_v48 }
 0x230   :  { %v306_v50 = vsel %vm305_vm8, %v301_v49, inf }
 0x231   :  { %307 = vmin.xlane.f32.xlu1 %v306_v50  ;;  %v311_v60 = vshll.u32 %v310_v54, 16 }
 0x2b6   :  { %v294_v55 = vpop.xlane.xlu0 %293 }
 0x2b7   :  { %v295_v57 = vcvt.f32.s32 %v294_v55 }
 0x2b9   :  { %v298_v59 = vadd.s32 %v297_v56, %v295_v57 }
 0x2ba   :  { %v308_v62 = vpop.xlane.xlu1 %307 }
 0x2bb   :  { %v424_v63 = vadd.s32 4294967292, %v298_v59  ;;  %v317_v0 = vadd.s32 4, %v298_v59  ;;  %v309_v2 = vcvt.f32.s32 %v308_v62 }
 0x2bd   :  { %v312_v4 = vadd.s32 %v311_v60, %v309_v2  ;;  %vm315_vm9 = vcmp.ge.s32.totalorder %v596_v20, %v424_v63  ;;  %vm319_vm10 = vcmp.lt.s32.totalorder %v596_v20, %v317_v0 }
 0x2be   :  { %vm616_vm11 = vmand %vm315_vm9, %vm319_vm10 }
 0x2bf   :  { %v425_v7 = vadd.s32 4294967292, %v312_v4  ;;  %v318_v8 = vadd.s32 4, %v312_v4  ;;  %vm326_vm13 = vmxor %vm616_vm11, %vm565_vm12  ;;  %v330_v13 = vsel %vm616_vm11, %v259_v10, 0.0 }
 0x2c0   :  { %vm328_vm14 = vmand %vm600_vm2, %vm326_vm13 }
 0x2c1   :  { %v336_v11 = vsel %vm328_vm14, %v259_v10, 0.0  ;;  %vm316_vm15 = vcmp.ge.s32.totalorder %v596_v20, %v425_v7  ;;  %vm320_vm0 = vcmp.lt.s32.totalorder %v596_v20, %v318_v8 }
 0x2c2   :  { %338 = vadd.xlane.f32.xlu0 %v336_v11  ;;  %vm322_vm1 = vmand %vm316_vm15, %vm320_vm0 }
 0x2c3   :  { %vm327_vm3 = vmxor %vm322_vm1, %vm565_vm12  ;;  %v331_v15 = vsel %vm322_vm1, %v260_v12, 0.0 }
 0x2c4   :  { %vm329_vm4 = vmand %vm600_vm2, %vm327_vm3  ;;  %vm388_vm2 = vcmask 122880  }
 0x2c5   :  { %v337_v14 = vsel %vm329_vm4, %v260_v12, 0.0 }
 0x2c6   :  { %332 = vadd.xlane.f32.xlu0 %v330_v13  ;;  %340 = vadd.xlane.f32.xlu1 %v337_v14 }
 0x2ca   :  { %334 = vadd.xlane.f32.xlu1 %v331_v15 }
 0x34b   :  { %v339_v16 = vpop.xlane.xlu0 %338 }
 0x34c   :  { %v342_v17 = vadd.f32 1e-07, %v339_v16 }
 0x34e   :  { %463 = vrcp.f32 %v342_v17 }
 0x34f   :  { %v341_v18 = vpop.xlane.xlu1 %340  ;;  %v333_v21 = vpop.xlane.xlu0 %332 }
 0x350   :  { %v343_v19 = vadd.f32 1e-07, %v341_v18 }
 0x352   :  { %465 = vrcp.f32 %v343_v19 }
 0x353   :  { %v335_v24 = vpop.xlane.xlu1 %334 }
 0x35b   :  { %v464_v20 = vpop.eup %463 }
 0x35c   :  { %v345_v22 = vmul.f32 %v464_v20, %v333_v21 }
 0x35e   :  { %467 = vlog2.f32 %v345_v22 }
 0x35f   :  { %v466_v23 = vpop.eup %465 }
 0x360   :  { %v347_v25 = vmul.f32 %v466_v23, %v335_v24 }
 0x362   :  { %469 = vlog2.f32 %v347_v25 }
 0x36b   :  { %v468_v26 = vpop.eup %467 }
 0x36c   :  { %v349_v27 = vmul.f32 0.6931472, %v468_v26 }
 0x36e   :  { %v352_v28 = vmul.f32 -10.0, %v349_v27 }
 0x36f   :  { %v470_v29 = vpop.eup %469 }
 0x370   :  { %v351_v30 = vmul.f32 0.6931472, %v470_v29  ;;  %v354_v31 = vmul.f32 0.4342945, %v352_v28 }
 0x372   :  { %356 = vxpose.xlu0.b32.start [1/2] (short) (narrow) %v354_v31, 8  ;;  %v353_v32 = vmul.f32 -10.0, %v351_v30 }
 0x374   :  { %v355_v33 = vmul.f32 0.4342945, %v353_v32 }
 0x376   :  { %357 = vxpose.xlu0.b32.end [2/2] (short) (narrow) %v355_v33, 8 }
 0x3ee   :  { %v372_v34 = vpop.trf.xlu0 }
 0x3ef   :  { %389 = vst.msk [vmem:[#allocation8] sm:$0x1] %vm388_vm2, %v372_v34 }
 0x3f0   :  { %542 = shalt.err (!%p539_p5)
}
 0x3f1   :  { %399 = dma.vmem_to_hbm [thread:$0]  %s397_s2, 16, %s636_s3, [#allocation4]  }
 0x3f2   :  { %555 = dma.done.wait [#allocation4], 16  }
 0x3f3   :  { %556 = vsyncadd [#allocation4], 4294967280 }
 0x3f4   :  { %403 = vsyncpa [#allocation3], 1 }
 0x3f5   :  { %404 = vsyncpa [#allocation6], 1 }
 0x3f6   :  { %405 = vsyncpa [#allocation4], 1 }

</bundles_post_ra>
